<compile_context>
chip_gen: v6e
topology: v6e:2x2x1
jax: 0.10.0
libtpu: 0.0.40
codegen_flags: <defaults>
</compile_context>

<pallas_src>
import jax
import jax.numpy as jnp
from jax.experimental import pallas as pl
from jax.experimental.pallas import tpu as pltpu


def mlp_kernel(p_ref, x_ref, o_ref):
    # p_ref: (H, I+1+2*O) param slab = [ W1^T | b1 | W2 | b2-embed ]
    # x_ref: (I, TB)  inputs, batch on lanes
    # o_ref: (O, TB)  logits, batch on lanes (lane-dense store)
    I, TB = x_ref.shape
    H = p_ref.shape[0]
    O = o_ref.shape[0]

    p = p_ref[...]          # single tiny VMEM load of the whole slab
    x = x_ref[...]

    # linear1 + tanh: h[j, b] = tanh(b1[j] + sum_i W1[i, j] * x[i, b])  (VPU/EUP only)
    acc = jnp.broadcast_to(p[:, I:I + 1], (H, TB))            # b1, broadcast over lanes
    for i in range(I):                                        # I is tiny and static
        acc = acc + p[:, i:i + 1] * x[i:i + 1, :]
    h = jnp.tanh(acc)

    # linear2: per output o, elementwise multiply + cross-sublane reduction.
    # b2[o] is embedded at row 0 of its own slab column so it folds into the sum.
    rows = []
    for o in range(O):
        w2_col = p[:, I + 1 + o:I + 2 + o]              # (H, 1)
        b2_col = p[:, I + 1 + O + o:I + 2 + O + o]      # (H, 1): [b2[o], 0, 0, ...]
        rows.append(jnp.sum(h * w2_col + b2_col, axis=0, keepdims=True))
    o_ref[...] = jnp.concatenate(rows, axis=0).astype(o_ref.dtype)


def simple_classifier(x, w1, b1, w2, b2, *, block_b=1024):
    """Fused Linear -> Tanh -> Linear.

    x : (B, num_inputs) float32
    w1: (num_inputs, num_hidden)   (PyTorch linear1.weight.T)
    b1: (num_hidden,)
    w2: (num_hidden, num_outputs)  (PyTorch linear2.weight.T)
    b2: (num_outputs,)
    returns (B, num_outputs)
    """
    B, I = x.shape
    H = w1.shape[1]
    O = w2.shape[1]
    dt = x.dtype

    # Single parameter slab (H, I + 1 + 2*O): [ W1^T | b1 | W2 | b2-embed ].
    b2_embed = jnp.zeros((H, O), dt).at[0, :].set(b2.astype(dt))
    params = jnp.concatenate(
        [w1.T.astype(dt), b1.reshape(H, 1).astype(dt), w2.astype(dt), b2_embed],
        axis=1)

    # Batch goes on the lane axis; pad it so every block is a multiple of 128 lanes.
    tb = min(block_b, max(128, ((B + 127) // 128) * 128))
    tb = ((tb + 127) // 128) * 128
    b_pad = ((B + tb - 1) // tb) * tb
    x_t = jnp.zeros((I, b_pad), dt).at[:, :B].set(x.T)

    out_t = pl.pallas_call(
        mlp_kernel,
        out_shape=jax.ShapeDtypeStruct((O, b_pad), dt),
        grid=(b_pad // tb,),
        in_specs=[
            pl.BlockSpec((H, I + 1 + 2 * O), lambda i: (0, 0)),  # VMEM-resident params
            pl.BlockSpec((I, tb), lambda i: (0, i)),             # streamed batch tile
        ],
        out_specs=pl.BlockSpec((O, tb), lambda i: (0, i)),       # lane-dense logits
        compiler_params=pltpu.CompilerParams(
            dimension_semantics=("parallel",)),
    )(params, x_t)

    return out_t[:, :B].T  # (B, O)


if __name__ == "__main__":
    # continuous-xor sizes: 2 inputs, small hidden layer, 1 output logit
    num_inputs, num_hidden, num_outputs = 2, 32, 1
    batch = 8

    key = jax.random.PRNGKey(0)
    kx, kw1, kb1, kw2, kb2 = jax.random.split(key, 5)

    # Deterministic params, PyTorch-style uniform(-1/sqrt(fan_in), 1/sqrt(fan_in))
    lim1 = 1.0 / jnp.sqrt(jnp.float32(num_inputs))
    lim2 = 1.0 / jnp.sqrt(jnp.float32(num_hidden))
    w1 = jax.random.uniform(kw1, (num_inputs, num_hidden), jnp.float32, -lim1, lim1)
    b1 = jax.random.uniform(kb1, (num_hidden,), jnp.float32, -lim1, lim1)
    w2 = jax.random.uniform(kw2, (num_hidden, num_outputs), jnp.float32, -lim2, lim2)
    b2 = jax.random.uniform(kb2, (num_outputs,), jnp.float32, -lim2, lim2)

    x = jax.random.uniform(kx, (batch, num_inputs), jnp.float32)

    out = simple_classifier(x, w1, b1, w2, b2)
    out = jax.block_until_ready(out)

    # Pure-JAX reference check of the same math
    ref = jnp.tanh(x @ w1 + b1) @ w2 + b2
    assert out.shape == (batch, num_outputs)
    assert jnp.allclose(out, ref, atol=1e-5, rtol=1e-5)

    print("KERNEL_OK")
</pallas_src>

<mosaic_0001>
module attributes {stable_mosaic.version = 11 : i64} {
  func.func @mlp_kernel(%arg0: i32, %arg1: memref<32x5xf32, #tpu.memory_space<vmem>>, %arg2: memref<2x128xf32, #tpu.memory_space<vmem>>, %arg3: memref<1x128xf32, #tpu.memory_space<vmem>>) attributes {dimension_semantics = [#tpu.dimension_semantics<parallel>], iteration_bounds = array<i64: 1>, scalar_prefetch = 0 : i64, scratch_operands = 0 : i64, tpu.core_type = #tpu.core_type<tc>, window_params = [{pipeline_mode = #tpu.pipeline_mode<synchronous>, transform_indices = @transform_0, window_bounds = array<i64: 32, 5>}, {transform_indices = @transform_1, window_bounds = array<i64: 2, 128>}, {transform_indices = @transform_2, window_bounds = array<i64: 1, 128>}]} {
    %c0 = arith.constant 0 : index
    %c0_0 = arith.constant 0 : index
    %0 = vector.load %arg1[%c0, %c0_0] : memref<32x5xf32, #tpu.memory_space<vmem>>, vector<32x5xf32>
    %c0_1 = arith.constant 0 : index
    %c0_2 = arith.constant 0 : index
    %1 = vector.load %arg2[%c0_1, %c0_2] : memref<2x128xf32, #tpu.memory_space<vmem>>, vector<2x128xf32>
    %2 = vector.extract_strided_slice %0 {offsets = [0, 2], sizes = [32, 1], strides = [1, 1]} : vector<32x5xf32> to vector<32x1xf32>
    %3 = vector.shape_cast %2 : vector<32x1xf32> to vector<32x1xf32>
    %4 = vector.broadcast %3 : vector<32x1xf32> to vector<32x128xf32>
    %5 = vector.extract_strided_slice %0 {offsets = [0, 0], sizes = [32, 1], strides = [1, 1]} : vector<32x5xf32> to vector<32x1xf32>
    %6 = vector.extract_strided_slice %1 {offsets = [0, 0], sizes = [1, 128], strides = [1, 1]} : vector<2x128xf32> to vector<1x128xf32>
    %7 = vector.broadcast %5 : vector<32x1xf32> to vector<32x128xf32>
    %8 = vector.broadcast %6 : vector<1x128xf32> to vector<32x128xf32>
    %9 = arith.mulf %7, %8 : vector<32x128xf32>
    %10 = arith.addf %4, %9 : vector<32x128xf32>
    %11 = vector.extract_strided_slice %0 {offsets = [0, 1], sizes = [32, 1], strides = [1, 1]} : vector<32x5xf32> to vector<32x1xf32>
    %12 = vector.extract_strided_slice %1 {offsets = [1, 0], sizes = [1, 128], strides = [1, 1]} : vector<2x128xf32> to vector<1x128xf32>
    %13 = vector.broadcast %11 : vector<32x1xf32> to vector<32x128xf32>
    %14 = vector.broadcast %12 : vector<1x128xf32> to vector<32x128xf32>
    %15 = arith.mulf %13, %14 : vector<32x128xf32>
    %16 = arith.addf %10, %15 : vector<32x128xf32>
    %17 = math.tanh %16 : vector<32x128xf32>
    %18 = vector.extract_strided_slice %0 {offsets = [0, 3], sizes = [32, 1], strides = [1, 1]} : vector<32x5xf32> to vector<32x1xf32>
    %19 = vector.extract_strided_slice %0 {offsets = [0, 4], sizes = [32, 1], strides = [1, 1]} : vector<32x5xf32> to vector<32x1xf32>
    %20 = vector.broadcast %18 : vector<32x1xf32> to vector<32x128xf32>
    %21 = arith.mulf %17, %20 : vector<32x128xf32>
    %22 = vector.broadcast %19 : vector<32x1xf32> to vector<32x128xf32>
    %23 = arith.addf %21, %22 : vector<32x128xf32>
    %cst = arith.constant dense<0.000000e+00> : vector<128xf32>
    %24 = vector.multi_reduction <add>, %23, %cst [0] : vector<32x128xf32> to vector<128xf32>
    %25 = vector.shape_cast %24 : vector<128xf32> to vector<1x128xf32>
    %c0_3 = arith.constant 0 : index
    %c0_4 = arith.constant 0 : index
    %26 = vector.load %arg3[%c0_3, %c0_4] : memref<1x128xf32, #tpu.memory_space<vmem>>, vector<1x128xf32>
    tpu.vector_store %arg3[%c0_3, %c0_4], %25 {strides = array<i32>} : memref<1x128xf32, #tpu.memory_space<vmem>>, vector<1x128xf32>,
    return
  }
  func.func @transform_0(%arg0: i32) -> (i32, i32) {
    %c0_i32 = arith.constant 0 : i32
    %c0_i32_0 = arith.constant 0 : i32
    %c0_i32_1 = arith.constant 0 : i32
    return %c0_i32, %c0_i32_0 : i32, i32
  }
  func.func @transform_1(%arg0: i32) -> (i32, i32) {
    %c0_i32 = arith.constant 0 : i32
    %c0_i32_0 = arith.constant 0 : i32
    return %c0_i32, %arg0 : i32, i32
  }
  func.func @transform_2(%arg0: i32) -> (i32, i32) {
    %c0_i32 = arith.constant 0 : i32
    %c0_i32_0 = arith.constant 0 : i32
    return %c0_i32, %arg0 : i32, i32
  }
}

</mosaic_0001>

<bundles_post_ra>
// kernel: tpu_custom_call.1
= control target key start
LH: loop header
LB: loop body
LE: loop exit
PB: predicated region body
PF: predicated region fallthrough
CT: control target
= control target key end

     0   :  { %v210_v1 = vmov 0   ;;  %v211_v2 = vmov 2   ;;  %s249_s0 = inlined_call_operand.vmem [shape: f32[32,5], index: 0, kind: input, shape index: {}]   ;;  %s250_s1 = inlined_call_operand.vmem [shape: f32[2,128], index: 1, kind: input, shape index: {}]   ;;  %s251_s2 = inlined_call_operand.hbm [shape: f32[1,128], index: 2, kind: output, shape index: {}]  }
   0x1   :  { %v12_v0 = vld [vmem:[%s249_s0] sm:$0xff]  ;;  %167 = vset.pattern.permute.xlu0 %v210_v1  ;;  %168 = vset.pattern.permute.xlu1 %v211_v2 }
   0x2   :  { %19 = vperm.xlu1 %168, %v12_v0   ;;  %38 = vperm.xlu0 %167, %v12_v0  }
   0x3   :  { %7 = vsyncpa [#allocation3], 0  ;;  %v13_v3 = vld [vmem:[%s249_s0 + $0x8] sm:$0xff]  ;;  %v14_v4 = vld [vmem:[%s249_s0 + $0x10] sm:$0xff]  ;;  %v212_v5 = vmov 1   ;;  %v213_v7 = vmov 3   ;;  %v53_v11 = vlaneseq }
   0x4   :  { %v15_v6 = vld [vmem:[%s249_s0 + $0x18] sm:$0xff]  ;;  %v214_v8 = vmov 4   ;;  %v16_v18 = vld [vmem:[%s250_s1] sm:$0x3]  ;;  %s215_s1 = smov [#allocation2]  }
   0x5   :  { %v54_v14 = vshrl.u32 %v53_v11, 7  ;;  %s153_s18 = sshll.u32 %s215_s1, 4  ;;  %s154_s18 = int_to_ptr.vmem [resolvable:$true] %s153_s18 }
   0x6   :  { %24 = vperm.xlu1 %168, %v13_v3   ;;  %42 = vperm.xlu0 %167, %v13_v3   ;;  %s188_s19 = scalar_lea.vmem %s154_s18, 16  ;;  %s192_s20 = scalar_lea.vmem %s154_s18, 32 }
   0x7   :  { %v55_v17 = vsub.s32 0, %v54_v14  ;;  %v83_v19 = vsub.s32 1, %v54_v14  ;;  %p189_p0 = scmp.ne.s32.totalorder %s154_s18, %s188_s19  ;;  %p193_p1 = scmp.lt.s32.totalorder %s154_s18, %s154_s18 }
   0x8   :  { %p194_p2 = scmp.lt.s32.totalorder %s192_s20, %s188_s19 }
   0x9   :  { %v56_v22 = vrot.slane %v16_v18, %v55_v17  ;;  %v84_v24 = vrot.slane %v16_v18, %v83_v19 }
   0xa   :  { %169 = vset.pattern.permute.xlu1 %v212_v5  ;;  %46 = vperm.xlu0 %167, %v14_v4   ;;  %p195_p3 = por %p194_p2, %p193_p1 }
   0xb   :  { %66 = vperm.xlu1 %169, %v12_v0  }
   0xc   :  { %p196_p4 = pnand %p195_p3, %p189_p0 }
   0xe   :  { %170 = vset.pattern.permute.xlu0 %v212_v5 }
   0xf   :  { %171 = vset.pattern.permute.xlu1 %v211_v2  ;;  %70 = vperm.xlu0 %170, %v13_v3  }
  0x10   :  { %29 = vperm.xlu1 %171, %v14_v4  }
  0x13   :  { %74 = vperm.xlu0 %170, %v14_v4  }
  0x14   :  { %172 = vset.pattern.permute.xlu1 %v210_v1 }
  0x15   :  { %50 = vperm.xlu1 %172, %v15_v6  }
  0x17   :  { %78 = vperm.xlu0 %170, %v15_v6  }
  0x19   :  { %173 = vset.pattern.permute.xlu1 %v211_v2 }
  0x1a   :  { %34 = vperm.xlu1 %173, %v15_v6  }
  0x1b   :  { %175 = vset.pattern.permute.xlu0 %v213_v7 }
  0x1c   :  { %102 = vperm.xlu0 %175, %v13_v3  }
  0x1e   :  { %174 = vset.pattern.permute.xlu1 %v213_v7 }
  0x1f   :  { %98 = vperm.xlu1 %174, %v12_v0  }
  0x20   :  { %177 = vset.pattern.permute.xlu0 %v214_v8 }
  0x21   :  { %122 = vperm.xlu0 %177, %v13_v3  }
  0x23   :  { %106 = vperm.xlu1 %174, %v14_v4  }
  0x25   :  { %130 = vperm.xlu0 %177, %v15_v6  }
  0x27   :  { %176 = vset.pattern.permute.xlu1 %v214_v8 }
  0x28   :  { %118 = vperm.xlu1 %176, %v12_v0  }
  0x2c   :  { %178 = vset.pattern.permute.xlu1 %v213_v7 }
  0x2d   :  { %110 = vperm.xlu1 %178, %v15_v6  }
  0x31   :  { %179 = vset.pattern.permute.xlu1 %v214_v8 }
  0x32   :  { %126 = vperm.xlu1 %179, %v14_v4  }
  0x7d   :  { %v20_v9 = vpop.permute.xlu1 %19  ;;  %v39_v10 = vpop.permute.xlu0 %38 }
  0x7e   :  { %v57_v26 = vmul.f32 %v56_v22, %v39_v10 }
  0x80   :  { %v61_v34 = vadd.f32 %v57_v26, %v20_v9 }
  0x81   :  { %v25_v12 = vpop.permute.xlu1 %24  ;;  %v43_v13 = vpop.permute.xlu0 %42 }
  0x82   :  { %v58_v23 = vmul.f32 %v56_v22, %v43_v13 }
  0x84   :  { %v62_v29 = vadd.f32 %v58_v23, %v25_v12 }
  0x85   :  { %v47_v15 = vpop.permute.xlu0 %46 }
  0x86   :  { %v67_v16 = vpop.permute.xlu1 %66  ;;  %v59_v31 = vmul.f32 %v56_v22, %v47_v15 }
  0x87   :  { %v85_v30 = vmul.f32 %v84_v24, %v67_v16 }
  0x89   :  { %v89_v39 = vadd.f32 %v85_v30, %v61_v34 }
  0x8a   :  { %v71_v20 = vpop.permute.xlu0 %70 }
  0x8b   :  { %v30_v21 = vpop.permute.xlu1 %29  ;;  %v86_v27 = vmul.f32 %v84_v24, %v71_v20 }
  0x8c   :  { %v63_v37 = vadd.f32 %v59_v31, %v30_v21 }
  0x8d   :  { %v90_v35 = vadd.f32 %v86_v27, %v62_v29 }
  0x8e   :  { %v75_v25 = vpop.permute.xlu0 %74 }
  0x8f   :  { %v87_v32 = vmul.f32 %v84_v24, %v75_v25  ;;  %180 = vtanh.f32 %v90_v35 }
  0x90   :  { %v51_v28 = vpop.permute.xlu1 %50  ;;  %182 = vtanh.f32 %v89_v39 }
  0x91   :  { %v60_v36 = vmul.f32 %v56_v22, %v51_v28  ;;  %v91_v42 = vadd.f32 %v87_v32, %v63_v37 }
  0x92   :  { %v79_v33 = vpop.permute.xlu0 %78 }
  0x93   :  { %v88_v40 = vmul.f32 %v84_v24, %v79_v33  ;;  %184 = vtanh.f32 %v91_v42 }
  0x95   :  { %v35_v38 = vpop.permute.xlu1 %34 }
  0x96   :  { %v64_v41 = vadd.f32 %v60_v36, %v35_v38 }
  0x97   :  { %v103_v46 = vpop.permute.xlu0 %102 }
  0x98   :  { %v92_v43 = vadd.f32 %v88_v40, %v64_v41 }
  0x9a   :  { %v99_v44 = vpop.permute.xlu1 %98  ;;  %186 = vtanh.f32 %v92_v43 }
  0x9c   :  { %v181_v48 = vpop.eup %180  ;;  %v123_v55 = vpop.permute.xlu0 %122 }
  0x9d   :  { %v183_v49 = vpop.eup %182  ;;  %v114_v52 = vmul.f32 %v181_v48, %v103_v46 }
  0x9e   :  { %v107_v45 = vpop.permute.xlu1 %106  ;;  %v113_v51 = vmul.f32 %v183_v49, %v99_v44 }
  0x9f   :  { %v134_v58 = vadd.f32 %v123_v55, %v114_v52 }
  0xa0   :  { %v185_v50 = vpop.eup %184  ;;  %v131_v60 = vpop.permute.xlu0 %130 }
  0xa1   :  { %v115_v57 = vmul.f32 %v185_v50, %v107_v45 }
  0xa3   :  { %v119_v47 = vpop.permute.xlu1 %118 }
  0xa4   :  { %v133_v56 = vadd.f32 %v119_v47, %v113_v51 }
  0xa6   :  { %v137_v62 = vadd.f32 %v134_v58, %v133_v56 }
  0xa7   :  { %v187_v54 = vpop.eup %186 }
  0xa8   :  { %v111_v53 = vpop.permute.xlu1 %110 }
  0xa9   :  { %v116_v59 = vmul.f32 %v187_v54, %v111_v53 }
  0xab   :  { %v136_v0 = vadd.f32 %v131_v60, %v116_v59 }
  0xad   :  { %v127_v61 = vpop.permute.xlu1 %126 }
  0xae   :  { %v135_v63 = vadd.f32 %v127_v61, %v115_v57 }
  0xb0   :  { %v138_v1 = vadd.f32 %v137_v62, %v135_v63 }
  0xb2   :  { %v139_v2 = vadd.f32 %v138_v1, %v136_v0 }
  0xb4   :  { %v140_v3 = vrot.slane %v139_v2, 4 }
  0xb6   :  { %v141_v4 = vadd.f32 %v140_v3, %v139_v2 }
  0xb8   :  { %v142_v5 = vrot.slane %v141_v4, 2 }
  0xba   :  { %v143_v6 = vadd.f32 %v142_v5, %v141_v4 }
  0xbc   :  { %v144_v7 = vrot.slane %v143_v6, 1 }
  0xbe   :  { %v145_v8 = vadd.f32 %v144_v7, %v143_v6 }
  0xc0   :  { %146 = vst [vmem:[#allocation2] sm:$0x1] %v145_v8 }
  0xc1   :  { %199 = shalt.err (!%p196_p4)
}
  0xc2   :  { %156 = dma.vmem_to_hbm [thread:$0]  %s154_s18, 16, %s251_s2, [#allocation3]  }
  0xc3   :  { %208 = dma.done.wait [#allocation3], 16  }
  0xc4   :  { %209 = vsyncadd [#allocation3], 4294967280 }
  0xc5   :  { %160 = vsyncpa [#allocation3], 1 }

</bundles_post_ra>
